<compile_context>
chip_gen: v5e
topology: v5e:2x2
jax: 0.10.0
libtpu: 0.0.40
codegen_flags: <defaults>
</compile_context>

<pallas_src>
import dataclasses
import functools

import numpy as np
import jax
import jax.numpy as jnp
from jax.experimental import pallas as pl
from jax.experimental.pallas import tpu as pltpu


_SMEM = functools.partial(pl.BlockSpec, memory_space=pltpu.MemorySpace.SMEM)


def _choose_tile(P, max_tile=8192):
    """Largest lane tile that is a multiple of 128, divides P and fits VMEM."""
    if P <= max_tile:
        return P
    t = max_tile - (max_tile % 128)
    while t >= 128:
        if P % t == 0:
            return t
        t -= 128
    return P  # fallback: a single full-width block is always legal


# ----------------------------------------------------------------------------
# Result container (mirror of FlowOUTrackingResult) + packing helpers
# ----------------------------------------------------------------------------
@dataclasses.dataclass
class FlowOUTrackingResult:
    flow: jnp.ndarray       # (2, H, W)  [flow_x, flow_y]
    occlusion: jnp.ndarray  # (1, H, W)
    sigma: jnp.ndarray      # (1, H, W)

    def clone(self):
        return FlowOUTrackingResult(self.flow, self.occlusion, self.sigma)

    @staticmethod
    def identity(shape):
        H, W = shape
        z = jnp.zeros((1, H, W), jnp.float32)
        return FlowOUTrackingResult(jnp.zeros((2, H, W), jnp.float32), z, z)


def _pack(result):
    """result -> packed (8, P): [fx, fy, occ, sigma, 0, 0, 0, 0]."""
    _, H, W = result.flow.shape
    P = H * W
    return jnp.concatenate([result.flow.reshape(2, P),
                            result.occlusion.reshape(1, P),
                            result.sigma.reshape(1, P),
                            jnp.zeros((4, P), jnp.float32)], axis=0)


def _unpack(packed, H, W):
    return FlowOUTrackingResult(packed[0:2].reshape(2, H, W),
                                packed[2:3].reshape(1, H, W),
                                packed[3:4].reshape(1, H, W))


def _identity_packed(H, W):
    return jnp.zeros((8, H * W), jnp.float32)


def _make_coords(H, W):
    ys, xs = jnp.meshgrid(jnp.arange(H, dtype=jnp.float32),
                          jnp.arange(W, dtype=jnp.float32), indexing="ij")
    return jnp.stack([xs.reshape(-1), ys.reshape(-1)], axis=0)  # (2, P) = [x, y]


# ----------------------------------------------------------------------------
# Kernel 1: batched synthetic "flower" (optical-flow network) head
# ----------------------------------------------------------------------------
def _flower_kernel(w_ref, b_ref, x_ref, out_ref):
    # w_ref: (8, 8) SMEM, b_ref: (8,) SMEM, x_ref: (2C, TP) VMEM,
    # out_ref: (8, TP) VMEM packed [fx, fy, occ, sigma, 0, 0, 0, 0].
    x = x_ref[...]
    c_in, tp = x.shape

    def head(r):
        # Per-pixel linear head row r via scalar-broadcast FMAs on the VPU.
        y = x[0:1, :] * w_ref[r, 0]
        for k in range(1, c_in):
            y = y + x[k:k + 1, :] * w_ref[r, k]
        return y + b_ref[r]

    y_fx, y_fy, y_occ, y_sig = head(0), head(1), head(2), head(3)
    out_ref[0:1, :] = jnp.tanh(y_fx) * 2.0
    out_ref[1:2, :] = jnp.tanh(y_fy) * 2.0
    out_ref[2:3, :] = 0.04 / (1.0 + jnp.exp(-y_occ))             # 0.04 * sigmoid
    # numerically stable softplus (avoids exp overflow)
    out_ref[3:4, :] = (jnp.maximum(y_sig, 0.0)
                       + jnp.log(1.0 + jnp.exp(-jnp.abs(y_sig))))
    out_ref[4:8, :] = jnp.zeros((4, tp), jnp.float32)


def _flower_pallas(weight, bias, x_stack):
    """x_stack: (N, 2C, P) stacked [left RGB, right RGB] -> (N, 8, P) packed."""
    n, c_in, P = x_stack.shape
    tp = _choose_tile(P)
    nt = P // tp
    return pl.pallas_call(
        _flower_kernel,
        out_shape=jax.ShapeDtypeStruct((n, 8, P), jnp.float32),
        grid=(n, nt),
        in_specs=[
            _SMEM(),                                                # weight (8, 8)
            _SMEM(),                                                # bias (8,)
            pl.BlockSpec((None, c_in, tp), lambda d, t: (d, 0, t)),
        ],
        out_specs=pl.BlockSpec((None, 8, tp), lambda d, t: (d, 0, t)),
        compiler_params=pltpu.CompilerParams(
            dimension_semantics=("parallel", "parallel")),
    )(weight, bias, x_stack)


# ----------------------------------------------------------------------------
# Bilinear backward warp (O(P) gather; the gather itself stays in XLA)
# ----------------------------------------------------------------------------
def _bilinear_warp(left_stack, values, H, W):
    """Backward-warp `values` (N, C, P) by the flow rows of left_stack (N, 8, P).

    Bilinear sampling at (x + fx, y + fy) with border clamping.
    """
    n, c, P = values.shape
    coords = _make_coords(H, W)
    px = jnp.clip(coords[0:1] + left_stack[:, 0, :], 0.0, float(W - 1))
    py = jnp.clip(coords[1:2] + left_stack[:, 1, :], 0.0, float(H - 1))
    x0 = jnp.floor(px)
    y0 = jnp.floor(py)
    wx = px - x0
    wy = py - y0
    x0i = x0.astype(jnp.int32)
    y0i = y0.astype(jnp.int32)
    x1i = jnp.minimum(x0i + 1, W - 1)
    y1i = jnp.minimum(y0i + 1, H - 1)

    def gather(yi, xi):
        idx = jnp.broadcast_to((yi * W + xi)[:, None, :], (n, c, P))
        return jnp.take_along_axis(values, idx, axis=2)

    w00 = ((1.0 - wx) * (1.0 - wy))[:, None, :]
    w01 = (wx * (1.0 - wy))[:, None, :]
    w10 = ((1.0 - wx) * wy)[:, None, :]
    w11 = (wx * wy)[:, None, :]
    return (gather(y0i, x0i) * w00 + gather(y0i, x1i) * w01 +
            gather(y1i, x0i) * w10 + gather(y1i, x1i) * w11)


# ----------------------------------------------------------------------------
# Kernel 2: fused chain + occlusion max + sigma RSS + best-delta selection
# ----------------------------------------------------------------------------
def _chain_select_kernel(thr_ref, coords_ref, left_ref, warped_ref,
                         out_ref, score_ref, *, H, W):
    # grid = (P_tiles, n_deltas); delta axis is an "arbitrary" reduction axis.
    n = pl.program_id(1)
    n_deltas = pl.num_programs(1)
    thr = thr_ref[0]
    left = left_ref[...]      # (8, TP) packed template -> left
    wrp = warped_ref[...]     # (8, TP) packed warp of (left -> right) by left.flow
    tp = left.shape[1]

    # chain_results: flow chaining, occlusion max, sigma root-sum-square
    cfx = left[0:1, :] + wrp[0:1, :]
    cfy = left[1:2, :] + wrp[1:2, :]
    cocc = jnp.maximum(left[2:3, :], wrp[2:3, :])
    csig = jnp.sqrt(left[3:4, :] * left[3:4, :] + wrp[3:4, :] * wrp[3:4, :])
    score = jnp.where(cocc > thr, -jnp.inf, -csig)

    @pl.when(n == 0)
    def _init():
        out_ref[0:1, :] = cfx
        out_ref[1:2, :] = cfy
        out_ref[2:3, :] = cocc
        out_ref[3:4, :] = csig
        out_ref[4:8, :] = jnp.zeros((4, tp), jnp.float32)
        score_ref[...] = score

    @pl.when(n > 0)
    def _update():
        better = score > score_ref[...]
        score_ref[...] = jnp.where(better, score, score_ref[...])
        out_ref[0:1, :] = jnp.where(better, cfx, out_ref[0:1, :])
        out_ref[1:2, :] = jnp.where(better, cfy, out_ref[1:2, :])
        out_ref[2:3, :] = jnp.where(better, cocc, out_ref[2:3, :])
        out_ref[3:4, :] = jnp.where(better, csig, out_ref[3:4, :])

    @pl.when(n == n_deltas - 1)
    def _finalize():
        # invalid_mask: best flow pointing outside the image -> occlusion = 1
        px = coords_ref[0:1, :] + out_ref[0:1, :]
        py = coords_ref[1:2, :] + out_ref[1:2, :]
        invalid = ((px < 0.0) | (px > float(W - 1)) |
                   (py < 0.0) | (py > float(H - 1)))
        out_ref[2:3, :] = jnp.where(invalid, 1.0, out_ref[2:3, :])


def _chain_select_pallas(thr, coords, left_stack, warped, *, H, W):
    n, _, P = left_stack.shape
    tp = _choose_tile(P)
    nt = P // tp
    return pl.pallas_call(
        functools.partial(_chain_select_kernel, H=H, W=W),
        out_shape=jax.ShapeDtypeStruct((8, P), jnp.float32),
        grid=(nt, n),
        in_specs=[
            _SMEM(),                                               # thr (1,) in SMEM
            pl.BlockSpec((2, tp), lambda t, d: (0, t)),            # coords
            pl.BlockSpec((None, 8, tp), lambda t, d: (d, 0, t)),   # left packed
            pl.BlockSpec((None, 8, tp), lambda t, d: (d, 0, t)),   # warped packed
        ],
        out_specs=pl.BlockSpec((8, tp), lambda t, d: (0, t)),
        scratch_shapes=[pltpu.VMEM((1, tp), jnp.float32)],
        compiler_params=pltpu.CompilerParams(
            dimension_semantics=("parallel", "arbitrary")),
    )(thr, coords, left_stack, warped)


# ----------------------------------------------------------------------------
# One fused device step per tracked frame
# ----------------------------------------------------------------------------
@functools.partial(jax.jit, static_argnames=("H", "W"))
def _track_step(left_imgs, right_img, left_packed, weight, bias, thr, *, H, W):
    """Batched flower -> bilinear warp -> fused chain+select.

    left_imgs / left_packed: tuples (one per used delta, sorted) of (C, P)
    images and (8, P) packed template->left results.  Returns packed (8, P).
    """
    x_stack = jnp.stack(
        [jnp.concatenate([li, right_img], axis=0) for li in left_imgs], axis=0)
    flower_out = _flower_pallas(weight, bias, x_stack)            # (N, 8, P)
    left_stack = jnp.stack(left_packed, axis=0)                   # (N, 8, P)
    warped = _bilinear_warp(left_stack, flower_out, H, W)         # (N, 8, P)
    coords = _make_coords(H, W)
    return _chain_select_pallas(thr, coords, left_stack, warped, H=H, W=W)


def chain_results(left_result, right_result):
    """Standalone chained flow + occlusion max + sigma RSS (API parity with the
    reference; MFT.track uses the fused Pallas chain+select kernel instead)."""
    _, H, W = left_result.flow.shape
    left = _pack(left_result)[None]
    right = _pack(right_result)[None]
    warped = _bilinear_warp(left, right, H, W)[0]
    flow = left[0, 0:2] + warped[0:2]
    occ = jnp.maximum(left[0, 2:3], warped[2:3])
    sig = jnp.sqrt(jnp.square(left[0, 3:4]) + jnp.square(warped[3:4]))
    return FlowOUTrackingResult(flow.reshape(2, H, W), occ.reshape(1, H, W),
                                sig.reshape(1, H, W))


# ----------------------------------------------------------------------------
# Synthetic flower (per-pixel linear flow head) + MFT module
# ----------------------------------------------------------------------------
class PallasFlower:
    """Deterministic stand-in for the RAFT flower.

    weight: (8, 8) f32, bias: (8,) f32.  Rows 0/1 -> flow (tanh * 2),
    row 2 -> occlusion (0.04 * sigmoid), row 3 -> sigma (softplus).
    """

    def __init__(self, weight, bias):
        self.weight = weight
        self.bias = bias

    def __call__(self, left_img, right_img):
        _, C, H, W = left_img.shape
        P = H * W
        x = jnp.concatenate([left_img[0].reshape(C, P),
                             right_img[0].reshape(C, P)], axis=0)[None]
        packed = _flower_pallas(self.weight, self.bias, x)[0]
        flow = packed[0:2].reshape(2, H, W)[None]
        occ = packed[2:3].reshape(1, H, W)[None]
        sigma = packed[3:4].reshape(1, H, W)[None]
        return flow, occ, sigma


class MFT:
    def __init__(self, flower, start_frame_i=0, time_direction=1,
                 occlusion_threshold=0.02,
                 deltas=(np.inf, 1, 2, 4, 8, 16, 32)):
        assert time_direction in (+1, -1)
        self.flower = flower
        self.time_direction = time_direction
        self.occlusion_threshold = occlusion_threshold
        # threshold travels as an SMEM scalar -> no recompile if it changes
        self._thr = jnp.asarray([occlusion_threshold], jnp.float32)
        self.deltas = list(deltas)
        self.start_frame_i = start_frame_i
        self.current_frame_i = start_frame_i
        self.memory = {}

    def __call__(self, img):
        if self.current_frame_i == self.start_frame_i:
            return self.init(img, self.start_frame_i)
        return self.track(img)

    def init(self, img, start_frame_i=0):
        self.img_H, self.img_W = img.shape[2:]
        C = img.shape[1]
        self.memory = {self.start_frame_i: {
            'img': img[0].reshape(C, self.img_H * self.img_W),
            'packed': _identity_packed(self.img_H, self.img_W)}}
        self.current_frame_i += self.time_direction
        return FlowOUTrackingResult.identity((self.img_H, self.img_W))

    def track(self, input_img):
        C = input_img.shape[1]
        right_img = input_img[0].reshape(C, self.img_H * self.img_W)

        delta_inputs = {}
        already_used_left_ids = []
        for delta in self.deltas:
            left_id = self.current_frame_i - delta * self.time_direction
            if self.is_before_start(left_id):
                if np.isinf(delta):
                    left_id = self.start_frame_i
                else:
                    continue
            left_id = int(left_id)
            if left_id in already_used_left_ids:
                continue
            delta_inputs[delta] = (self.memory[left_id]['img'],
                                   self.memory[left_id]['packed'])
            already_used_left_ids.append(left_id)

        used_deltas = sorted(delta_inputs.keys(),
                             key=lambda d: 0 if np.isinf(d) else d)
        left_imgs = tuple(delta_inputs[d][0] for d in used_deltas)
        left_packed = tuple(delta_inputs[d][1] for d in used_deltas)

        # one fused device step for all deltas; packed (8, P) stays resident
        out_packed = _track_step(left_imgs, right_img, left_packed,
                                 self.flower.weight, self.flower.bias,
                                 self._thr, H=self.img_H, W=self.img_W)

        self.memory[self.current_frame_i] = {'img': right_img,
                                             'packed': out_packed}
        self.cleanup_memory()
        self.current_frame_i += self.time_direction
        return _unpack(out_packed, self.img_H, self.img_W)

    def cleanup_memory(self):
        finite = [d for d in self.deltas if np.isfinite(d)]
        max_delta = max(finite) if finite else 0
        has_direct_flow = any(np.isinf(d) for d in self.deltas)
        for mem_frame_i in list(self.memory.keys()):
            if mem_frame_i == self.start_frame_i and has_direct_flow:
                continue
            if self.time_direction > 0 and mem_frame_i + max_delta > self.current_frame_i:
                continue
            if self.time_direction < 0 and mem_frame_i - max_delta < self.current_frame_i:
                continue
            del self.memory[mem_frame_i]

    def is_before_start(self, frame_i):
        if self.time_direction > 0:
            return frame_i < self.start_frame_i
        return frame_i > self.start_frame_i


# ----------------------------------------------------------------------------
if __name__ == "__main__":
    key = jax.random.PRNGKey(0)
    B, C, H, W = 1, 3, 16, 16
    n_frames = 5

    k_w, k_b, k_img = jax.random.split(key, 3)
    flower_w = (jax.random.normal(k_w, (8, 8)) * 0.3).astype(jnp.float32)
    flower_b = (jax.random.normal(k_b, (8,)) * 0.1).astype(jnp.float32)
    flower = PallasFlower(flower_w, flower_b)

    mft = MFT(flower, start_frame_i=0, time_direction=1,
              occlusion_threshold=0.02, deltas=[np.inf, 1, 2, 4, 8, 16, 32])

    frames = jax.random.uniform(k_img, (n_frames, B, C, H, W),
                                dtype=jnp.float32)

    result = None
    for t in range(n_frames):
        result = mft(frames[t])

    jax.block_until_ready(result.flow)
    jax.block_until_ready(result.occlusion)
    jax.block_until_ready(result.sigma)
    assert result.flow.shape == (2, H, W)
    assert result.occlusion.shape == (1, H, W)
    assert result.sigma.shape == (1, H, W)
    print("KERNEL_OK")
</pallas_src>

<mosaic_0001>
module attributes {stable_mosaic.version = 11 : i64} {
  func.func @_flower_kernel(%arg0: i32, %arg1: i32, %arg2: memref<8x8xf32, #tpu.memory_space<smem>>, %arg3: memref<8xf32, #tpu.memory_space<smem>>, %arg4: memref<1x6x256xf32, #tpu.memory_space<vmem>>, %arg5: memref<1x8x256xf32, #tpu.memory_space<vmem>>) attributes {dimension_semantics = [#tpu.dimension_semantics<parallel>, #tpu.dimension_semantics<parallel>], iteration_bounds = array<i64: 1, 1>, scalar_prefetch = 0 : i64, scratch_operands = 0 : i64, tpu.core_type = #tpu.core_type<tc>, window_params = [{transform_indices = @transform_0, window_bounds = array<i64: 8, 8>}, {transform_indices = @transform_1, window_bounds = array<i64: 8>}, {transform_indices = @transform_2, window_bounds = array<i64: 1, 6, 256>}, {transform_indices = @transform_3, window_bounds = array<i64: 1, 8, 256>}]} {
    %c0 = arith.constant 0 : index
    %c0_0 = arith.constant 0 : index
    %c0_1 = arith.constant 0 : index
    %0 = vector.load %arg4[%c0, %c0_0, %c0_1] : memref<1x6x256xf32, #tpu.memory_space<vmem>>, vector<1x6x256xf32>
    %1 = vector.shape_cast %0 : vector<1x6x256xf32> to vector<6x256xf32>
    %2 = vector.extract_strided_slice %1 {offsets = [0, 0], sizes = [1, 256], strides = [1, 1]} : vector<6x256xf32> to vector<1x256xf32>
    %c0_2 = arith.constant 0 : index
    %c0_3 = arith.constant 0 : index
    %3 = memref.load %arg2[%c0_2, %c0_3] : memref<8x8xf32, #tpu.memory_space<smem>>
    %4 = vector.broadcast %3 : f32 to vector<1x256xf32>
    %5 = arith.mulf %2, %4 : vector<1x256xf32>
    %6 = vector.extract_strided_slice %1 {offsets = [1, 0], sizes = [1, 256], strides = [1, 1]} : vector<6x256xf32> to vector<1x256xf32>
    %c0_4 = arith.constant 0 : index
    %c1 = arith.constant 1 : index
    %7 = memref.load %arg2[%c0_4, %c1] : memref<8x8xf32, #tpu.memory_space<smem>>
    %8 = vector.broadcast %7 : f32 to vector<1x256xf32>
    %9 = arith.mulf %6, %8 : vector<1x256xf32>
    %10 = arith.addf %5, %9 : vector<1x256xf32>
    %11 = vector.extract_strided_slice %1 {offsets = [2, 0], sizes = [1, 256], strides = [1, 1]} : vector<6x256xf32> to vector<1x256xf32>
    %c0_5 = arith.constant 0 : index
    %c2 = arith.constant 2 : index
    %12 = memref.load %arg2[%c0_5, %c2] : memref<8x8xf32, #tpu.memory_space<smem>>
    %13 = vector.broadcast %12 : f32 to vector<1x256xf32>
    %14 = arith.mulf %11, %13 : vector<1x256xf32>
    %15 = arith.addf %10, %14 : vector<1x256xf32>
    %16 = vector.extract_strided_slice %1 {offsets = [3, 0], sizes = [1, 256], strides = [1, 1]} : vector<6x256xf32> to vector<1x256xf32>
    %c0_6 = arith.constant 0 : index
    %c3 = arith.constant 3 : index
    %17 = memref.load %arg2[%c0_6, %c3] : memref<8x8xf32, #tpu.memory_space<smem>>
    %18 = vector.broadcast %17 : f32 to vector<1x256xf32>
    %19 = arith.mulf %16, %18 : vector<1x256xf32>
    %20 = arith.addf %15, %19 : vector<1x256xf32>
    %21 = vector.extract_strided_slice %1 {offsets = [4, 0], sizes = [1, 256], strides = [1, 1]} : vector<6x256xf32> to vector<1x256xf32>
    %c0_7 = arith.constant 0 : index
    %c4 = arith.constant 4 : index
    %22 = memref.load %arg2[%c0_7, %c4] : memref<8x8xf32, #tpu.memory_space<smem>>
    %23 = vector.broadcast %22 : f32 to vector<1x256xf32>
    %24 = arith.mulf %21, %23 : vector<1x256xf32>
    %25 = arith.addf %20, %24 : vector<1x256xf32>
    %26 = vector.extract_strided_slice %1 {offsets = [5, 0], sizes = [1, 256], strides = [1, 1]} : vector<6x256xf32> to vector<1x256xf32>
    %c0_8 = arith.constant 0 : index
    %c5 = arith.constant 5 : index
    %27 = memref.load %arg2[%c0_8, %c5] : memref<8x8xf32, #tpu.memory_space<smem>>
    %28 = vector.broadcast %27 : f32 to vector<1x256xf32>
    %29 = arith.mulf %26, %28 : vector<1x256xf32>
    %30 = arith.addf %25, %29 : vector<1x256xf32>
    %c0_9 = arith.constant 0 : index
    %31 = memref.load %arg3[%c0_9] : memref<8xf32, #tpu.memory_space<smem>>
    %32 = vector.broadcast %31 : f32 to vector<1x256xf32>
    %33 = arith.addf %30, %32 : vector<1x256xf32>
    %34 = vector.extract_strided_slice %1 {offsets = [0, 0], sizes = [1, 256], strides = [1, 1]} : vector<6x256xf32> to vector<1x256xf32>
    %c1_10 = arith.constant 1 : index
    %c0_11 = arith.constant 0 : index
    %35 = memref.load %arg2[%c1_10, %c0_11] : memref<8x8xf32, #tpu.memory_space<smem>>
    %36 = vector.broadcast %35 : f32 to vector<1x256xf32>
    %37 = arith.mulf %34, %36 : vector<1x256xf32>
    %38 = vector.extract_strided_slice %1 {offsets = [1, 0], sizes = [1, 256], strides = [1, 1]} : vector<6x256xf32> to vector<1x256xf32>
    %c1_12 = arith.constant 1 : index
    %c1_13 = arith.constant 1 : index
    %39 = memref.load %arg2[%c1_12, %c1_13] : memref<8x8xf32, #tpu.memory_space<smem>>
    %40 = vector.broadcast %39 : f32 to vector<1x256xf32>
    %41 = arith.mulf %38, %40 : vector<1x256xf32>
    %42 = arith.addf %37, %41 : vector<1x256xf32>
    %43 = vector.extract_strided_slice %1 {offsets = [2, 0], sizes = [1, 256], strides = [1, 1]} : vector<6x256xf32> to vector<1x256xf32>
    %c1_14 = arith.constant 1 : index
    %c2_15 = arith.constant 2 : index
    %44 = memref.load %arg2[%c1_14, %c2_15] : memref<8x8xf32, #tpu.memory_space<smem>>
    %45 = vector.broadcast %44 : f32 to vector<1x256xf32>
    %46 = arith.mulf %43, %45 : vector<1x256xf32>
    %47 = arith.addf %42, %46 : vector<1x256xf32>
    %48 = vector.extract_strided_slice %1 {offsets = [3, 0], sizes = [1, 256], strides = [1, 1]} : vector<6x256xf32> to vector<1x256xf32>
    %c1_16 = arith.constant 1 : index
    %c3_17 = arith.constant 3 : index
    %49 = memref.load %arg2[%c1_16, %c3_17] : memref<8x8xf32, #tpu.memory_space<smem>>
    %50 = vector.broadcast %49 : f32 to vector<1x256xf32>
    %51 = arith.mulf %48, %50 : vector<1x256xf32>
    %52 = arith.addf %47, %51 : vector<1x256xf32>
    %53 = vector.extract_strided_slice %1 {offsets = [4, 0], sizes = [1, 256], strides = [1, 1]} : vector<6x256xf32> to vector<1x256xf32>
    %c1_18 = arith.constant 1 : index
    %c4_19 = arith.constant 4 : index
    %54 = memref.load %arg2[%c1_18, %c4_19] : memref<8x8xf32, #tpu.memory_space<smem>>
    %55 = vector.broadcast %54 : f32 to vector<1x256xf32>
    %56 = arith.mulf %53, %55 : vector<1x256xf32>
    %57 = arith.addf %52, %56 : vector<1x256xf32>
    %58 = vector.extract_strided_slice %1 {offsets = [5, 0], sizes = [1, 256], strides = [1, 1]} : vector<6x256xf32> to vector<1x256xf32>
    %c1_20 = arith.constant 1 : index
    %c5_21 = arith.constant 5 : index
    %59 = memref.load %arg2[%c1_20, %c5_21] : memref<8x8xf32, #tpu.memory_space<smem>>
    %60 = vector.broadcast %59 : f32 to vector<1x256xf32>
    %61 = arith.mulf %58, %60 : vector<1x256xf32>
    %62 = arith.addf %57, %61 : vector<1x256xf32>
    %c1_22 = arith.constant 1 : index
    %63 = memref.load %arg3[%c1_22] : memref<8xf32, #tpu.memory_space<smem>>
    %64 = vector.broadcast %63 : f32 to vector<1x256xf32>
    %65 = arith.addf %62, %64 : vector<1x256xf32>
    %66 = vector.extract_strided_slice %1 {offsets = [0, 0], sizes = [1, 256], strides = [1, 1]} : vector<6x256xf32> to vector<1x256xf32>
    %c2_23 = arith.constant 2 : index
    %c0_24 = arith.constant 0 : index
    %67 = memref.load %arg2[%c2_23, %c0_24] : memref<8x8xf32, #tpu.memory_space<smem>>
    %68 = vector.broadcast %67 : f32 to vector<1x256xf32>
    %69 = arith.mulf %66, %68 : vector<1x256xf32>
    %70 = vector.extract_strided_slice %1 {offsets = [1, 0], sizes = [1, 256], strides = [1, 1]} : vector<6x256xf32> to vector<1x256xf32>
    %c2_25 = arith.constant 2 : index
    %c1_26 = arith.constant 1 : index
    %71 = memref.load %arg2[%c2_25, %c1_26] : memref<8x8xf32, #tpu.memory_space<smem>>
    %72 = vector.broadcast %71 : f32 to vector<1x256xf32>
    %73 = arith.mulf %70, %72 : vector<1x256xf32>
    %74 = arith.addf %69, %73 : vector<1x256xf32>
    %75 = vector.extract_strided_slice %1 {offsets = [2, 0], sizes = [1, 256], strides = [1, 1]} : vector<6x256xf32> to vector<1x256xf32>
    %c2_27 = arith.constant 2 : index
    %c2_28 = arith.constant 2 : index
    %76 = memref.load %arg2[%c2_27, %c2_28] : memref<8x8xf32, #tpu.memory_space<smem>>
    %77 = vector.broadcast %76 : f32 to vector<1x256xf32>
    %78 = arith.mulf %75, %77 : vector<1x256xf32>
    %79 = arith.addf %74, %78 : vector<1x256xf32>
    %80 = vector.extract_strided_slice %1 {offsets = [3, 0], sizes = [1, 256], strides = [1, 1]} : vector<6x256xf32> to vector<1x256xf32>
    %c2_29 = arith.constant 2 : index
    %c3_30 = arith.constant 3 : index
    %81 = memref.load %arg2[%c2_29, %c3_30] : memref<8x8xf32, #tpu.memory_space<smem>>
    %82 = vector.broadcast %81 : f32 to vector<1x256xf32>
    %83 = arith.mulf %80, %82 : vector<1x256xf32>
    %84 = arith.addf %79, %83 : vector<1x256xf32>
    %85 = vector.extract_strided_slice %1 {offsets = [4, 0], sizes = [1, 256], strides = [1, 1]} : vector<6x256xf32> to vector<1x256xf32>
    %c2_31 = arith.constant 2 : index
    %c4_32 = arith.constant 4 : index
    %86 = memref.load %arg2[%c2_31, %c4_32] : memref<8x8xf32, #tpu.memory_space<smem>>
    %87 = vector.broadcast %86 : f32 to vector<1x256xf32>
    %88 = arith.mulf %85, %87 : vector<1x256xf32>
    %89 = arith.addf %84, %88 : vector<1x256xf32>
    %90 = vector.extract_strided_slice %1 {offsets = [5, 0], sizes = [1, 256], strides = [1, 1]} : vector<6x256xf32> to vector<1x256xf32>
    %c2_33 = arith.constant 2 : index
    %c5_34 = arith.constant 5 : index
    %91 = memref.load %arg2[%c2_33, %c5_34] : memref<8x8xf32, #tpu.memory_space<smem>>
    %92 = vector.broadcast %91 : f32 to vector<1x256xf32>
    %93 = arith.mulf %90, %92 : vector<1x256xf32>
    %94 = arith.addf %89, %93 : vector<1x256xf32>
    %c2_35 = arith.constant 2 : index
    %95 = memref.load %arg3[%c2_35] : memref<8xf32, #tpu.memory_space<smem>>
    %96 = vector.broadcast %95 : f32 to vector<1x256xf32>
    %97 = arith.addf %94, %96 : vector<1x256xf32>
    %98 = vector.extract_strided_slice %1 {offsets = [0, 0], sizes = [1, 256], strides = [1, 1]} : vector<6x256xf32> to vector<1x256xf32>
    %c3_36 = arith.constant 3 : index
    %c0_37 = arith.constant 0 : index
    %99 = memref.load %arg2[%c3_36, %c0_37] : memref<8x8xf32, #tpu.memory_space<smem>>
    %100 = vector.broadcast %99 : f32 to vector<1x256xf32>
    %101 = arith.mulf %98, %100 : vector<1x256xf32>
    %102 = vector.extract_strided_slice %1 {offsets = [1, 0], sizes = [1, 256], strides = [1, 1]} : vector<6x256xf32> to vector<1x256xf32>
    %c3_38 = arith.constant 3 : index
    %c1_39 = arith.constant 1 : index
    %103 = memref.load %arg2[%c3_38, %c1_39] : memref<8x8xf32, #tpu.memory_space<smem>>
    %104 = vector.broadcast %103 : f32 to vector<1x256xf32>
    %105 = arith.mulf %102, %104 : vector<1x256xf32>
    %106 = arith.addf %101, %105 : vector<1x256xf32>
    %107 = vector.extract_strided_slice %1 {offsets = [2, 0], sizes = [1, 256], strides = [1, 1]} : vector<6x256xf32> to vector<1x256xf32>
    %c3_40 = arith.constant 3 : index
    %c2_41 = arith.constant 2 : index
    %108 = memref.load %arg2[%c3_40, %c2_41] : memref<8x8xf32, #tpu.memory_space<smem>>
    %109 = vector.broadcast %108 : f32 to vector<1x256xf32>
    %110 = arith.mulf %107, %109 : vector<1x256xf32>
    %111 = arith.addf %106, %110 : vector<1x256xf32>
    %112 = vector.extract_strided_slice %1 {offsets = [3, 0], sizes = [1, 256], strides = [1, 1]} : vector<6x256xf32> to vector<1x256xf32>
    %c3_42 = arith.constant 3 : index
    %c3_43 = arith.constant 3 : index
    %113 = memref.load %arg2[%c3_42, %c3_43] : memref<8x8xf32, #tpu.memory_space<smem>>
    %114 = vector.broadcast %113 : f32 to vector<1x256xf32>
    %115 = arith.mulf %112, %114 : vector<1x256xf32>
    %116 = arith.addf %111, %115 : vector<1x256xf32>
    %117 = vector.extract_strided_slice %1 {offsets = [4, 0], sizes = [1, 256], strides = [1, 1]} : vector<6x256xf32> to vector<1x256xf32>
    %c3_44 = arith.constant 3 : index
    %c4_45 = arith.constant 4 : index
    %118 = memref.load %arg2[%c3_44, %c4_45] : memref<8x8xf32, #tpu.memory_space<smem>>
    %119 = vector.broadcast %118 : f32 to vector<1x256xf32>
    %120 = arith.mulf %117, %119 : vector<1x256xf32>
    %121 = arith.addf %116, %120 : vector<1x256xf32>
    %122 = vector.extract_strided_slice %1 {offsets = [5, 0], sizes = [1, 256], strides = [1, 1]} : vector<6x256xf32> to vector<1x256xf32>
    %c3_46 = arith.constant 3 : index
    %c5_47 = arith.constant 5 : index
    %123 = memref.load %arg2[%c3_46, %c5_47] : memref<8x8xf32, #tpu.memory_space<smem>>
    %124 = vector.broadcast %123 : f32 to vector<1x256xf32>
    %125 = arith.mulf %122, %124 : vector<1x256xf32>
    %126 = arith.addf %121, %125 : vector<1x256xf32>
    %c3_48 = arith.constant 3 : index
    %127 = memref.load %arg3[%c3_48] : memref<8xf32, #tpu.memory_space<smem>>
    %128 = vector.broadcast %127 : f32 to vector<1x256xf32>
    %129 = arith.addf %126, %128 : vector<1x256xf32>
    %130 = math.tanh %33 : vector<1x256xf32>
    %cst = arith.constant 2.000000e+00 : f32
    %131 = vector.broadcast %cst : f32 to vector<1x256xf32>
    %132 = arith.mulf %130, %131 : vector<1x256xf32>
    %c0_49 = arith.constant 0 : index
    %c0_50 = arith.constant 0 : index
    %c0_51 = arith.constant 0 : index
    %133 = vector.load %arg5[%c0_49, %c0_50, %c0_51] : memref<1x8x256xf32, #tpu.memory_space<vmem>>, vector<1x1x256xf32>
    %134 = vector.shape_cast %133 : vector<1x1x256xf32> to vector<1x256xf32>
    %135 = vector.shape_cast %132 : vector<1x256xf32> to vector<1x1x256xf32>
    tpu.vector_store %arg5[%c0_49, %c0_50, %c0_51], %135 {strides = array<i32>} : memref<1x8x256xf32, #tpu.memory_space<vmem>>, vector<1x1x256xf32>,
    %136 = math.tanh %65 : vector<1x256xf32>
    %cst_52 = arith.constant 2.000000e+00 : f32
    %137 = vector.broadcast %cst_52 : f32 to vector<1x256xf32>
    %138 = arith.mulf %136, %137 : vector<1x256xf32>
    %c0_53 = arith.constant 0 : index
    %c1_54 = arith.constant 1 : index
    %c0_55 = arith.constant 0 : index
    %139 = vector.load %arg5[%c0_53, %c1_54, %c0_55] : memref<1x8x256xf32, #tpu.memory_space<vmem>>, vector<1x1x256xf32>
    %140 = vector.shape_cast %139 : vector<1x1x256xf32> to vector<1x256xf32>
    %141 = vector.shape_cast %138 : vector<1x256xf32> to vector<1x1x256xf32>
    tpu.vector_store %arg5[%c0_53, %c1_54, %c0_55], %141 {strides = array<i32>} : memref<1x8x256xf32, #tpu.memory_space<vmem>>, vector<1x1x256xf32>,
    %cst_56 = arith.constant 0.000000e+00 : f32
    %142 = vector.broadcast %cst_56 : f32 to vector<1x256xf32>
    %143 = arith.subf %142, %97 : vector<1x256xf32>
    %144 = math.exp %143 : vector<1x256xf32>
    %cst_57 = arith.constant 1.000000e+00 : f32
    %145 = vector.broadcast %cst_57 : f32 to vector<1x256xf32>
    %146 = arith.addf %145, %144 : vector<1x256xf32>
    %cst_58 = arith.constant 4.000000e-02 : f32
    %147 = vector.broadcast %cst_58 : f32 to vector<1x256xf32>
    %148 = arith.divf %147, %146 : vector<1x256xf32>
    %c0_59 = arith.constant 0 : index
    %c2_60 = arith.constant 2 : index
    %c0_61 = arith.constant 0 : index
    %149 = vector.load %arg5[%c0_59, %c2_60, %c0_61] : memref<1x8x256xf32, #tpu.memory_space<vmem>>, vector<1x1x256xf32>
    %150 = vector.shape_cast %149 : vector<1x1x256xf32> to vector<1x256xf32>
    %151 = vector.shape_cast %148 : vector<1x256xf32> to vector<1x1x256xf32>
    tpu.vector_store %arg5[%c0_59, %c2_60, %c0_61], %151 {strides = array<i32>} : memref<1x8x256xf32, #tpu.memory_space<vmem>>, vector<1x1x256xf32>,
    %cst_62 = arith.constant 0.000000e+00 : f32
    %152 = vector.broadcast %cst_62 : f32 to vector<1x256xf32>
    %153 = arith.maximumf %129, %152 : vector<1x256xf32>
    %154 = math.absf %129 : vector<1x256xf32>
    %cst_63 = arith.constant 0.000000e+00 : f32
    %155 = vector.broadcast %cst_63 : f32 to vector<1x256xf32>
    %156 = arith.subf %155, %154 : vector<1x256xf32>
    %157 = math.exp %156 : vector<1x256xf32>
    %cst_64 = arith.constant 1.000000e+00 : f32
    %158 = vector.broadcast %cst_64 : f32 to vector<1x256xf32>
    %159 = arith.addf %158, %157 : vector<1x256xf32>
    %160 = math.log %159 : vector<1x256xf32>
    %161 = arith.addf %153, %160 : vector<1x256xf32>
    %c0_65 = arith.constant 0 : index
    %c3_66 = arith.constant 3 : index
    %c0_67 = arith.constant 0 : index
    %162 = vector.load %arg5[%c0_65, %c3_66, %c0_67] : memref<1x8x256xf32, #tpu.memory_space<vmem>>, vector<1x1x256xf32>
    %163 = vector.shape_cast %162 : vector<1x1x256xf32> to vector<1x256xf32>
    %164 = vector.shape_cast %161 : vector<1x256xf32> to vector<1x1x256xf32>
    tpu.vector_store %arg5[%c0_65, %c3_66, %c0_67], %164 {strides = array<i32>} : memref<1x8x256xf32, #tpu.memory_space<vmem>>, vector<1x1x256xf32>,
    %cst_68 = arith.constant 0.000000e+00 : f32
    %165 = vector.broadcast %cst_68 : f32 to vector<4x256xf32>
    %c0_69 = arith.constant 0 : index
    %c4_70 = arith.constant 4 : index
    %c0_71 = arith.constant 0 : index
    %166 = vector.load %arg5[%c0_69, %c4_70, %c0_71] : memref<1x8x256xf32, #tpu.memory_space<vmem>>, vector<1x4x256xf32>
    %167 = vector.shape_cast %166 : vector<1x4x256xf32> to vector<4x256xf32>
    %168 = vector.shape_cast %165 : vector<4x256xf32> to vector<1x4x256xf32>
    tpu.vector_store %arg5[%c0_69, %c4_70, %c0_71], %168 {strides = array<i32>} : memref<1x8x256xf32, #tpu.memory_space<vmem>>, vector<1x4x256xf32>,
    return
  }
  func.func @transform_0(%arg0: i32, %arg1: i32) -> (i32, i32) {
    %c0_i32 = arith.constant 0 : i32
    %c0_i32_0 = arith.constant 0 : i32
    %c0_i32_1 = arith.constant 0 : i32
    return %c0_i32, %c0_i32_0 : i32, i32
  }
  func.func @transform_1(%arg0: i32, %arg1: i32) -> i32 {
    %c0_i32 = arith.constant 0 : i32
    %c0_i32_0 = arith.constant 0 : i32
    return %c0_i32 : i32
  }
  func.func @transform_2(%arg0: i32, %arg1: i32) -> (i32, i32, i32) {
    %c0_i32 = arith.constant 0 : i32
    %c0_i32_0 = arith.constant 0 : i32
    return %arg0, %c0_i32, %arg1 : i32, i32, i32
  }
  func.func @transform_3(%arg0: i32, %arg1: i32) -> (i32, i32, i32) {
    %c0_i32 = arith.constant 0 : i32
    %c0_i32_0 = arith.constant 0 : i32
    return %arg0, %c0_i32, %arg1 : i32, i32, i32
  }
}

module attributes {stable_mosaic.version = 11 : i64} {
  func.func @_chain_select_kernel(%arg0: i32, %arg1: i32, %arg2: memref<1xf32, #tpu.memory_space<smem>>, %arg3: memref<2x256xf32, #tpu.memory_space<vmem>>, %arg4: memref<1x8x256xf32, #tpu.memory_space<vmem>>, %arg5: memref<1x8x256xf32, #tpu.memory_space<vmem>>, %arg6: memref<8x256xf32, #tpu.memory_space<vmem>>, %arg7: memref<1x256xf32, #tpu.memory_space<vmem>>) attributes {dimension_semantics = [#tpu.dimension_semantics<parallel>, #tpu.dimension_semantics<arbitrary>], iteration_bounds = array<i64: 1, 1>, scalar_prefetch = 0 : i64, scratch_operands = 1 : i64, tpu.core_type = #tpu.core_type<tc>, window_params = [{transform_indices = @transform_0, window_bounds = array<i64: 1>}, {transform_indices = @transform_1, window_bounds = array<i64: 2, 256>}, {transform_indices = @transform_2, window_bounds = array<i64: 1, 8, 256>}, {transform_indices = @transform_3, window_bounds = array<i64: 1, 8, 256>}, {transform_indices = @transform_4, window_bounds = array<i64: 8, 256>}]} {
    %c0 = arith.constant 0 : index
    %0 = memref.load %arg2[%c0] : memref<1xf32, #tpu.memory_space<smem>>
    %c0_0 = arith.constant 0 : index
    %c0_1 = arith.constant 0 : index
    %c0_2 = arith.constant 0 : index
    %1 = vector.load %arg4[%c0_0, %c0_1, %c0_2] : memref<1x8x256xf32, #tpu.memory_space<vmem>>, vector<1x8x256xf32>
    %2 = vector.shape_cast %1 : vector<1x8x256xf32> to vector<8x256xf32>
    %c0_3 = arith.constant 0 : index
    %c0_4 = arith.constant 0 : index
    %c0_5 = arith.constant 0 : index
    %3 = vector.load %arg5[%c0_3, %c0_4, %c0_5] : memref<1x8x256xf32, #tpu.memory_space<vmem>>, vector<1x8x256xf32>
    %4 = vector.shape_cast %3 : vector<1x8x256xf32> to vector<8x256xf32>
    %5 = vector.extract_strided_slice %2 {offsets = [0, 0], sizes = [1, 256], strides = [1, 1]} : vector<8x256xf32> to vector<1x256xf32>
    %6 = vector.extract_strided_slice %4 {offsets = [0, 0], sizes = [1, 256], strides = [1, 1]} : vector<8x256xf32> to vector<1x256xf32>
    %7 = arith.addf %5, %6 : vector<1x256xf32>
    %8 = vector.extract_strided_slice %2 {offsets = [1, 0], sizes = [1, 256], strides = [1, 1]} : vector<8x256xf32> to vector<1x256xf32>
    %9 = vector.extract_strided_slice %4 {offsets = [1, 0], sizes = [1, 256], strides = [1, 1]} : vector<8x256xf32> to vector<1x256xf32>
    %10 = arith.addf %8, %9 : vector<1x256xf32>
    %11 = vector.extract_strided_slice %2 {offsets = [2, 0], sizes = [1, 256], strides = [1, 1]} : vector<8x256xf32> to vector<1x256xf32>
    %12 = vector.extract_strided_slice %4 {offsets = [2, 0], sizes = [1, 256], strides = [1, 1]} : vector<8x256xf32> to vector<1x256xf32>
    %13 = arith.maximumf %11, %12 : vector<1x256xf32>
    %14 = vector.extract_strided_slice %2 {offsets = [3, 0], sizes = [1, 256], strides = [1, 1]} : vector<8x256xf32> to vector<1x256xf32>
    %15 = vector.extract_strided_slice %2 {offsets = [3, 0], sizes = [1, 256], strides = [1, 1]} : vector<8x256xf32> to vector<1x256xf32>
    %16 = arith.mulf %14, %15 : vector<1x256xf32>
    %17 = vector.extract_strided_slice %4 {offsets = [3, 0], sizes = [1, 256], strides = [1, 1]} : vector<8x256xf32> to vector<1x256xf32>
    %18 = vector.extract_strided_slice %4 {offsets = [3, 0], sizes = [1, 256], strides = [1, 1]} : vector<8x256xf32> to vector<1x256xf32>
    %19 = arith.mulf %17, %18 : vector<1x256xf32>
    %20 = arith.addf %16, %19 : vector<1x256xf32>
    %21 = math.sqrt %20 : vector<1x256xf32>
    %22 = vector.broadcast %0 : f32 to vector<1x256xf32>
    %23 = arith.cmpf ogt, %13, %22 : vector<1x256xf32>
    %cst = arith.constant 0.000000e+00 : f32
    %24 = vector.broadcast %cst : f32 to vector<1x256xf32>
    %25 = arith.subf %24, %21 : vector<1x256xf32>
    %cst_6 = arith.constant 0xFF800000 : f32
    %26 = vector.broadcast %cst_6 : f32 to vector<1x256xf32>
    %27 = arith.select %23, %26, %25 : vector<1x256xi1>, vector<1x256xf32>
    %c0_i32 = arith.constant 0 : i32
    %28 = arith.cmpi eq, %arg1, %c0_i32 : i32
    %29 = arith.extui %28 : i1 to i32
    %c0_i32_7 = arith.constant 0 : i32
    %30 = arith.cmpi ne, %29, %c0_i32_7 : i32
    scf.if %30 {
      %c0_12 = arith.constant 0 : index
      %c0_13 = arith.constant 0 : index
      %37 = vector.load %arg6[%c0_12, %c0_13] : memref<8x256xf32, #tpu.memory_space<vmem>>, vector<1x256xf32>
      tpu.vector_store %arg6[%c0_12, %c0_13], %7 {strides = array<i32>} : memref<8x256xf32, #tpu.memory_space<vmem>>, vector<1x256xf32>,
      %c1 = arith.constant 1 : index
      %c0_14 = arith.constant 0 : index
      %38 = vector.load %arg6[%c1, %c0_14] : memref<8x256xf32, #tpu.memory_space<vmem>>, vector<1x256xf32>
      tpu.vector_store %arg6[%c1, %c0_14], %10 {strides = array<i32>} : memref<8x256xf32, #tpu.memory_space<vmem>>, vector<1x256xf32>,
      %c2 = arith.constant 2 : index
      %c0_15 = arith.constant 0 : index
      %39 = vector.load %arg6[%c2, %c0_15] : memref<8x256xf32, #tpu.memory_space<vmem>>, vector<1x256xf32>
      tpu.vector_store %arg6[%c2, %c0_15], %13 {strides = array<i32>} : memref<8x256xf32, #tpu.memory_space<vmem>>, vector<1x256xf32>,
      %c3 = arith.constant 3 : index
      %c0_16 = arith.constant 0 : index
      %40 = vector.load %arg6[%c3, %c0_16] : memref<8x256xf32, #tpu.memory_space<vmem>>, vector<1x256xf32>
      tpu.vector_store %arg6[%c3, %c0_16], %21 {strides = array<i32>} : memref<8x256xf32, #tpu.memory_space<vmem>>, vector<1x256xf32>,
      %cst_17 = arith.constant 0.000000e+00 : f32
      %41 = vector.broadcast %cst_17 : f32 to vector<4x256xf32>
      %c4 = arith.constant 4 : index
      %c0_18 = arith.constant 0 : index
      %42 = vector.load %arg6[%c4, %c0_18] : memref<8x256xf32, #tpu.memory_space<vmem>>, vector<4x256xf32>
      tpu.vector_store %arg6[%c4, %c0_18], %41 {strides = array<i32>} : memref<8x256xf32, #tpu.memory_space<vmem>>, vector<4x256xf32>,
      %c0_19 = arith.constant 0 : index
      %c0_20 = arith.constant 0 : index
      %43 = vector.load %arg7[%c0_19, %c0_20] : memref<1x256xf32, #tpu.memory_space<vmem>>, vector<1x256xf32>
      tpu.vector_store %arg7[%c0_19, %c0_20], %27 {strides = array<i32>} : memref<1x256xf32, #tpu.memory_space<vmem>>, vector<1x256xf32>,
    } else {
    }
    %c0_i32_8 = arith.constant 0 : i32
    %31 = arith.cmpi sgt, %arg1, %c0_i32_8 : i32
    %32 = arith.extui %31 : i1 to i32
    %c0_i32_9 = arith.constant 0 : i32
    %33 = arith.cmpi ne, %32, %c0_i32_9 : i32
    scf.if %33 {
      %c0_12 = arith.constant 0 : index
      %c0_13 = arith.constant 0 : index
      %37 = vector.load %arg7[%c0_12, %c0_13] : memref<1x256xf32, #tpu.memory_space<vmem>>, vector<1x256xf32>
      %38 = arith.cmpf ogt, %27, %37 : vector<1x256xf32>
      %c0_14 = arith.constant 0 : index
      %c0_15 = arith.constant 0 : index
      %39 = vector.load %arg7[%c0_14, %c0_15] : memref<1x256xf32, #tpu.memory_space<vmem>>, vector<1x256xf32>
      %40 = arith.select %38, %27, %39 : vector<1x256xi1>, vector<1x256xf32>
      %c0_16 = arith.constant 0 : index
      %c0_17 = arith.constant 0 : index
      %41 = vector.load %arg7[%c0_16, %c0_17] : memref<1x256xf32, #tpu.memory_space<vmem>>, vector<1x256xf32>
      tpu.vector_store %arg7[%c0_16, %c0_17], %40 {strides = array<i32>} : memref<1x256xf32, #tpu.memory_space<vmem>>, vector<1x256xf32>,
      %c0_18 = arith.constant 0 : index
      %c0_19 = arith.constant 0 : index
      %42 = vector.load %arg6[%c0_18, %c0_19] : memref<8x256xf32, #tpu.memory_space<vmem>>, vector<1x256xf32>
      %43 = arith.select %38, %7, %42 : vector<1x256xi1>, vector<1x256xf32>
      %c0_20 = arith.constant 0 : index
      %c0_21 = arith.constant 0 : index
      %44 = vector.load %arg6[%c0_20, %c0_21] : memref<8x256xf32, #tpu.memory_space<vmem>>, vector<1x256xf32>
      tpu.vector_store %arg6[%c0_20, %c0_21], %43 {strides = array<i32>} : memref<8x256xf32, #tpu.memory_space<vmem>>, vector<1x256xf32>,
      %c1 = arith.constant 1 : index
      %c0_22 = arith.constant 0 : index
      %45 = vector.load %arg6[%c1, %c0_22] : memref<8x256xf32, #tpu.memory_space<vmem>>, vector<1x256xf32>
      %46 = arith.select %38, %10, %45 : vector<1x256xi1>, vector<1x256xf32>
      %c1_23 = arith.constant 1 : index
      %c0_24 = arith.constant 0 : index
      %47 = vector.load %arg6[%c1_23, %c0_24] : memref<8x256xf32, #tpu.memory_space<vmem>>, vector<1x256xf32>
      tpu.vector_store %arg6[%c1_23, %c0_24], %46 {strides = array<i32>} : memref<8x256xf32, #tpu.memory_space<vmem>>, vector<1x256xf32>,
      %c2 = arith.constant 2 : index
      %c0_25 = arith.constant 0 : index
      %48 = vector.load %arg6[%c2, %c0_25] : memref<8x256xf32, #tpu.memory_space<vmem>>, vector<1x256xf32>
      %49 = arith.select %38, %13, %48 : vector<1x256xi1>, vector<1x256xf32>
      %c2_26 = arith.constant 2 : index
      %c0_27 = arith.constant 0 : index
      %50 = vector.load %arg6[%c2_26, %c0_27] : memref<8x256xf32, #tpu.memory_space<vmem>>, vector<1x256xf32>
      tpu.vector_store %arg6[%c2_26, %c0_27], %49 {strides = array<i32>} : memref<8x256xf32, #tpu.memory_space<vmem>>, vector<1x256xf32>,
      %c3 = arith.constant 3 : index
      %c0_28 = arith.constant 0 : index
      %51 = vector.load %arg6[%c3, %c0_28] : memref<8x256xf32, #tpu.memory_space<vmem>>, vector<1x256xf32>
      %52 = arith.select %38, %21, %51 : vector<1x256xi1>, vector<1x256xf32>
      %c3_29 = arith.constant 3 : index
      %c0_30 = arith.constant 0 : index
      %53 = vector.load %arg6[%c3_29, %c0_30] : memref<8x256xf32, #tpu.memory_space<vmem>>, vector<1x256xf32>
      tpu.vector_store %arg6[%c3_29, %c0_30], %52 {strides = array<i32>} : memref<8x256xf32, #tpu.memory_space<vmem>>, vector<1x256xf32>,
    } else {
    }
    %c0_i32_10 = arith.constant 0 : i32
    %34 = arith.cmpi eq, %arg1, %c0_i32_10 : i32
    %35 = arith.extui %34 : i1 to i32
    %c0_i32_11 = arith.constant 0 : i32
    %36 = arith.cmpi ne, %35, %c0_i32_11 : i32
    scf.if %36 {
      %c0_12 = arith.constant 0 : index
      %c0_13 = arith.constant 0 : index
      %37 = vector.load %arg3[%c0_12, %c0_13] : memref<2x256xf32, #tpu.memory_space<vmem>>, vector<1x256xf32>
      %c0_14 = arith.constant 0 : index
      %c0_15 = arith.constant 0 : index
      %38 = vector.load %arg6[%c0_14, %c0_15] : memref<8x256xf32, #tpu.memory_space<vmem>>, vector<1x256xf32>
      %39 = arith.addf %37, %38 : vector<1x256xf32>
      %c1 = arith.constant 1 : index
      %c0_16 = arith.constant 0 : index
      %40 = vector.load %arg3[%c1, %c0_16] : memref<2x256xf32, #tpu.memory_space<vmem>>, vector<1x256xf32>
      %c1_17 = arith.constant 1 : index
      %c0_18 = arith.constant 0 : index
      %41 = vector.load %arg6[%c1_17, %c0_18] : memref<8x256xf32, #tpu.memory_space<vmem>>, vector<1x256xf32>
      %42 = arith.addf %40, %41 : vector<1x256xf32>
      %cst_19 = arith.constant 0.000000e+00 : f32
      %43 = vector.broadcast %cst_19 : f32 to vector<1x256xf32>
      %44 = arith.cmpf olt, %39, %43 : vector<1x256xf32>
      %cst_20 = arith.constant 1.500000e+01 : f32
      %45 = vector.broadcast %cst_20 : f32 to vector<1x256xf32>
      %46 = arith.cmpf ogt, %39, %45 : vector<1x256xf32>
      %47 = arith.ori %44, %46 : vector<1x256xi1>
      %cst_21 = arith.constant 0.000000e+00 : f32
      %48 = vector.broadcast %cst_21 : f32 to vector<1x256xf32>
      %49 = arith.cmpf olt, %42, %48 : vector<1x256xf32>
      %50 = arith.ori %47, %49 : vector<1x256xi1>
      %cst_22 = arith.constant 1.500000e+01 : f32
      %51 = vector.broadcast %cst_22 : f32 to vector<1x256xf32>
      %52 = arith.cmpf ogt, %42, %51 : vector<1x256xf32>
      %53 = arith.ori %50, %52 : vector<1x256xi1>
      %c2 = arith.constant 2 : index
      %c0_23 = arith.constant 0 : index
      %54 = vector.load %arg6[%c2, %c0_23] : memref<8x256xf32, #tpu.memory_space<vmem>>, vector<1x256xf32>
      %cst_24 = arith.constant 1.000000e+00 : f32
      %55 = vector.broadcast %cst_24 : f32 to vector<1x256xf32>
      %56 = arith.select %53, %55, %54 : vector<1x256xi1>, vector<1x256xf32>
      %c2_25 = arith.constant 2 : index
      %c0_26 = arith.constant 0 : index
      %57 = vector.load %arg6[%c2_25, %c0_26] : memref<8x256xf32, #tpu.memory_space<vmem>>, vector<1x256xf32>
      tpu.vector_store %arg6[%c2_25, %c0_26], %56 {strides = array<i32>} : memref<8x256xf32, #tpu.memory_space<vmem>>, vector<1x256xf32>,
    } else {
    }
    return
  }
  func.func @transform_0(%arg0: i32, %arg1: i32) -> i32 {
    %c0_i32 = arith.constant 0 : i32
    %c0_i32_0 = arith.constant 0 : i32
    return %c0_i32 : i32
  }
  func.func @transform_1(%arg0: i32, %arg1: i32) -> (i32, i32) {
    %c0_i32 = arith.constant 0 : i32
    %c0_i32_0 = arith.constant 0 : i32
    return %c0_i32, %arg0 : i32, i32
  }
  func.func @transform_2(%arg0: i32, %arg1: i32) -> (i32, i32, i32) {
    %c0_i32 = arith.constant 0 : i32
    %c0_i32_0 = arith.constant 0 : i32
    return %arg1, %c0_i32, %arg0 : i32, i32, i32
  }
  func.func @transform_3(%arg0: i32, %arg1: i32) -> (i32, i32, i32) {
    %c0_i32 = arith.constant 0 : i32
    %c0_i32_0 = arith.constant 0 : i32
    return %arg1, %c0_i32, %arg0 : i32, i32, i32
  }
  func.func @transform_4(%arg0: i32, %arg1: i32) -> (i32, i32) {
    %c0_i32 = arith.constant 0 : i32
    %c0_i32_0 = arith.constant 0 : i32
    return %c0_i32, %arg0 : i32, i32
  }
}

</mosaic_0001>

<bundles_post_ra>
// kernel: _track_step.2
= control target key start
LH: loop header
LB: loop body
LE: loop exit
PB: predicated region body
PF: predicated region fallthrough
CT: control target
= control target key end

     0   :  { %8 = vsyncpa [#allocation3], 0  ;;  %s698_s0 = inlined_call_operand.vmem [shape: f32[8,8], index: 0, kind: input, shape index: {}]   ;;  %s699_s1 = inlined_call_operand.vmem [shape: f32[8], index: 1, kind: input, shape index: {}]   ;;  %s700_s2 = inlined_call_operand.vmem [shape: f32[1,6,256], index: 2, kind: input, shape index: {}]   ;;  %s701_s3 = inlined_call_operand.vmem [shape: f32[1,8,256], index: 3, kind: output, shape index: {}]  }
   0x1   :  { %s15_s14 = sshll.u32 %s698_s0, 4  ;;  %s16_s14 = int_to_ptr.vmem [resolvable:$true] %s15_s14 }
   0x2   :  { %9 = vsyncpa [#allocation5], 0  ;;  %s24_s17 = sshll.u32 %s699_s1, 4  ;;  %s505_s18 = smov [#allocation2]   ;;  %s25_s17 = int_to_ptr.vmem [resolvable:$true] %s24_s17 }
   0x3   :  { %18 = dma.vmem_to_smem %s16_s14, 128, %s505_s18, [#allocation3]  }
   0x4   :  { %s506_s19 = smov [#allocation4]  }
   0x5   :  { %27 = dma.vmem_to_smem %s25_s17, 16, %s506_s19, [#allocation5]  }
   0x6   :  { %501 = dma.done.wait [#allocation3], 128  }
   0x7   :  { %502 = vsyncadd [#allocation3], 4294967168 }
   0x8   :  { %503 = dma.done.wait [#allocation5], 16  }
   0x9   :  { %504 = vsyncadd [#allocation5], 4294967280 }
   0xa   :  { %38 = sfence }
   0xb   :  { %s41_s20 = sld [smem:[#allocation2]]  ;;  %v541_v0 = vld [vmem:[%s700_s2] sm:$0x3f]  ;;  %v548_v2 = vld [vmem:[%s700_s2 + $0x8] sm:$0x3f]  ;;  %v323_v12 = vlaneseq  ;;  %vm320_vm0 = vcmask 1040384  }
   0xc   :  { %s421_s21 = sld [smem:[#allocation2 + $0x1]] }
   0xd   :  { %s422_s22 = sld [smem:[#allocation2 + $0x2]]  ;;  %vm611_vm1 = vcmp.lt.s32.totalorder %v323_v12, 256 }
   0xe   :  { %s423_s0 = sld [smem:[#allocation2 + $0x3]] }
   0xf   :  { %s534_s23 = sld [smem:[#allocation2 + $0x4]] }
  0x10   :  { %s536_s24 = sld [smem:[#allocation2 + $0x5]] }
  0x11   :  { %v42_v1 = vstv %s41_s20  ;;  %s543_s26 = sld [smem:[#allocation4]] }
  0x12   :  { %v43_v3 = vmul.f32 %v42_v1, %v541_v0  ;;  %v46_v4 = vstv %s421_s21  ;;  %s551_s29 = sld [smem:[#allocation2 + $0x80]]  ;;  %v44_v5 = vmul.f32 %v42_v1, %v548_v2 }
  0x13   :  { %v47_v6 = vmul.f32 %v46_v4, %v541_v0  ;;  %v48_v7 = vmul.f32 %v46_v4, %v548_v2  ;;  %v58_v8 = vstv %s422_s22  ;;  %s556_s30 = sld [smem:[#allocation2 + $0x81]] }
  0x14   :  { %v59_v9 = vmul.f32 %v58_v8, %v541_v0  ;;  %v60_v10 = vmul.f32 %v58_v8, %v548_v2  ;;  %v70_v11 = vstv %s423_s0  ;;  %s560_s2 = sld [smem:[#allocation2 + $0x82]] }
  0x15   :  { %v51_v13 = vrot.slane %v47_v6, 1  ;;  %v52_v14 = vrot.slane %v48_v7, 1  ;;  %v71_v15 = vmul.f32 %v70_v11, %v541_v0  ;;  %v72_v16 = vmul.f32 %v70_v11, %v548_v2  ;;  %s564_s4 = sld [smem:[#allocation2 + $0x83]] }
  0x16   :  { %v63_v17 = vrot.slane %v59_v9, 2  ;;  %v64_v18 = vrot.slane %v60_v10, 2  ;;  %v82_v19 = vstv %s534_s23  ;;  %v94_v20 = vstv %s536_s24  ;;  %s568_s5 = sld [smem:[#allocation2 + $0x84]] }
  0x17   :  { %v55_v21 = vadd.f32 %v51_v13, %v43_v3  ;;  %v56_v22 = vadd.f32 %v52_v14, %v44_v5  ;;  %v75_v23 = vrot.slane %v71_v15, 3  ;;  %v76_v24 = vrot.slane %v72_v16, 3  ;;  %s576_s6 = sld [smem:[#allocation2 + $0x85]] }
  0x18   :  { %v83_v25 = vmul.f32 %v82_v19, %v541_v0  ;;  %v84_v26 = vmul.f32 %v82_v19, %v548_v2  ;;  %v95_v27 = vmul.f32 %v94_v20, %v541_v0  ;;  %v96_v28 = vmul.f32 %v94_v20, %v548_v2  ;;  %s578_s7 = sld [smem:[#allocation4 + $0x1]] }
  0x19   :  { %v67_v29 = vadd.f32 %v63_v17, %v55_v21  ;;  %v68_v30 = vadd.f32 %v64_v18, %v56_v22  ;;  %v106_v31 = vstv %s543_s26  ;;  %v110_v32 = vstv %s551_s29  ;;  %s582_s8 = sld [smem:[#allocation2 + $0x100]] }
  0x1a   :  { %v87_v33 = vrot.slane %v83_v25, 4  ;;  %v88_v34 = vrot.slane %v84_v26, 4  ;;  %v99_v35 = vrot.slane %v95_v27, 5  ;;  %v100_v36 = vrot.slane %v96_v28, 5  ;;  %s588_s9 = sld [smem:[#allocation2 + $0x101]] }
  0x1b   :  { %v79_v37 = vadd.f32 %v75_v23, %v67_v29  ;;  %v80_v38 = vadd.f32 %v76_v24, %v68_v30  ;;  %v111_v39 = vmul.f32 %v110_v32, %v541_v0  ;;  %v112_v40 = vmul.f32 %v110_v32, %v548_v2  ;;  %s592_s10 = sld [smem:[#allocation2 + $0x102]] }
  0x1c   :  { %v114_v41 = vstv %s556_s30  ;;  %v126_v42 = vstv %s560_s2  ;;  %v138_v43 = vstv %s564_s4  ;;  %v150_v44 = vstv %s568_s5  ;;  %s598_s11 = sld [smem:[#allocation2 + $0x103]] }
  0x1d   :  { %v91_v45 = vadd.f32 %v87_v33, %v79_v37  ;;  %v92_v46 = vadd.f32 %v88_v34, %v80_v38  ;;  %v115_v47 = vmul.f32 %v114_v41, %v541_v0  ;;  %v116_v48 = vmul.f32 %v114_v41, %v548_v2  ;;  %s600_s12 = sld [smem:[#allocation2 + $0x104]] }
  0x1e   :  { %v127_v49 = vmul.f32 %v126_v42, %v541_v0  ;;  %v128_v50 = vmul.f32 %v126_v42, %v548_v2  ;;  %v139_v51 = vmul.f32 %v138_v43, %v541_v0  ;;  %v140_v52 = vmul.f32 %v138_v43, %v548_v2  ;;  %s602_s13 = sld [smem:[#allocation2 + $0x105]] }
  0x1f   :  { %v103_v53 = vadd.f32 %v99_v35, %v91_v45  ;;  %v104_v54 = vadd.f32 %v100_v36, %v92_v46  ;;  %v119_v55 = vrot.slane %v115_v47, 1  ;;  %v120_v56 = vrot.slane %v116_v48, 1  ;;  %s621_s14 = sld [smem:[#allocation4 + $0x2]] }
  0x20   :  { %v131_v57 = vrot.slane %v127_v49, 2  ;;  %v132_v58 = vrot.slane %v128_v50, 2  ;;  %v143_v59 = vrot.slane %v139_v51, 3  ;;  %v144_v60 = vrot.slane %v140_v52, 3  ;;  %s627_s15 = sld [smem:[#allocation2 + $0x180]] }
  0x21   :  { %v107_v61 = vadd.f32 %v106_v31, %v103_v53  ;;  %v108_v62 = vadd.f32 %v106_v31, %v104_v54  ;;  %v123_v63 = vadd.f32 %v119_v55, %v111_v39  ;;  %v124_v1 = vadd.f32 %v120_v56, %v112_v40  ;;  %s629_s16 = sld [smem:[#allocation2 + $0x181]] }
  0x22   :  { %v151_v3 = vmul.f32 %v150_v44, %v541_v0  ;;  %v152_v4 = vmul.f32 %v150_v44, %v548_v2  ;;  %v162_v5 = vstv %s576_s6  ;;  %v174_v6 = vstv %s578_s7  ;;  %s634_s17 = sld [smem:[#allocation2 + $0x182]] }
  0x23   :  { %453 = vtanh.f32 %v107_v61  ;;  %v135_v7 = vadd.f32 %v131_v57, %v123_v63  ;;  %v136_v8 = vadd.f32 %v132_v58, %v124_v1  ;;  %v163_v9 = vmul.f32 %v162_v5, %v541_v0  ;;  %s638_s18 = sld [smem:[#allocation2 + $0x183]] }
  0x24   :  { %455 = vtanh.f32 %v108_v62  ;;  %v155_v10 = vrot.slane %v151_v3, 4  ;;  %v156_v11 = vrot.slane %v152_v4, 4  ;;  %v164_v13 = vmul.f32 %v162_v5, %v548_v2  ;;  %s650_s21 = sld [smem:[#allocation2 + $0x184]] }
  0x25   :  { %v147_v15 = vadd.f32 %v143_v59, %v135_v7  ;;  %v148_v16 = vadd.f32 %v144_v60, %v136_v8  ;;  %v167_v17 = vrot.slane %v163_v9, 5  ;;  %v178_v18 = vstv %s582_s8  ;;  %s659_s22 = sld [smem:[#allocation2 + $0x185]] }
  0x26   :  { %v168_v19 = vrot.slane %v164_v13, 5  ;;  %v179_v20 = vmul.f32 %v178_v18, %v541_v0  ;;  %v180_v21 = vmul.f32 %v178_v18, %v548_v2  ;;  %v182_v22 = vstv %s588_s9  ;;  %s446_s0 = sld [smem:[#allocation4 + $0x3]] }
  0x27   :  { %v159_v23 = vadd.f32 %v155_v10, %v147_v15  ;;  %v160_v24 = vadd.f32 %v156_v11, %v148_v16  ;;  %v183_v25 = vmul.f32 %v182_v22, %v541_v0  ;;  %v184_v12 = vmul.f32 %v182_v22, %v548_v2 }
  0x28   :  { %v194_v26 = vstv %s592_s10  ;;  %v206_v27 = vstv %s598_s11  ;;  %v218_v28 = vstv %s600_s12  ;;  %v230_v29 = vstv %s602_s13 }
  0x29   :  { %v454_v30 = vpop.eup %453  ;;  %v171_v31 = vadd.f32 %v167_v17, %v159_v23  ;;  %v172_v32 = vadd.f32 %v168_v19, %v160_v24  ;;  %v187_v33 = vrot.slane %v183_v25, 1  ;;  %v188_v34 = vrot.slane %v184_v12, 1 }
  0x2a   :  { %v456_v35 = vpop.eup %455  ;;  %v315_v36 = vmul.f32 2.0, %v454_v30  ;;  %v195_v37 = vmul.f32 %v194_v26, %v541_v0  ;;  %v196_v38 = vmul.f32 %v194_v26, %v548_v2  ;;  %v207_v39 = vmul.f32 %v206_v27, %v541_v0 }
  0x2b   :  { %v316_v40 = vmul.f32 2.0, %v456_v35  ;;  %v175_v41 = vadd.f32 %v174_v6, %v171_v31  ;;  %v176_v42 = vadd.f32 %v174_v6, %v172_v32  ;;  %v191_v43 = vadd.f32 %v187_v33, %v179_v20 }
  0x2c   :  { %v192_v44 = vadd.f32 %v188_v34, %v180_v21  ;;  %v199_v45 = vrot.slane %v195_v37, 2  ;;  %v200_v46 = vrot.slane %v196_v38, 2  ;;  %v208_v47 = vmul.f32 %v206_v27, %v548_v2 }
  0x2d   :  { %v319_v48 = vrot.slane %v316_v40, 7  ;;  %457 = vtanh.f32 %v175_v41  ;;  %v211_v49 = vrot.slane %v207_v39, 3  ;;  %v219_v50 = vmul.f32 %v218_v28, %v541_v0 }
  0x2e   :  { %459 = vtanh.f32 %v176_v42  ;;  %v203_v51 = vadd.f32 %v199_v45, %v191_v43  ;;  %v204_v52 = vadd.f32 %v200_v46, %v192_v44  ;;  %v212_v53 = vrot.slane %v208_v47, 3 }
  0x2f   :  { %v321_v54 = vsel %vm320_vm0, %v315_v36, %v319_v48  ;;  %v220_v55 = vmul.f32 %v218_v28, %v548_v2  ;;  %v223_v56 = vrot.slane %v219_v50, 4  ;;  %v231_v57 = vmul.f32 %v230_v29, %v541_v0 }
  0x30   :  { %327 = vst.msk [vmem:[%s701_s3] ss:$8 sm:$0x3] %vm611_vm1, %v321_v54  ;;  %v215_v58 = vadd.f32 %v211_v49, %v203_v51  ;;  %v216_v59 = vadd.f32 %v212_v53, %v204_v52  ;;  %v232_v60 = vmul.f32 %v230_v29, %v548_v2  ;;  %v242_v61 = vstv %s621_s14 }
  0x31   :  { %v224_v62 = vrot.slane %v220_v55, 4  ;;  %v235_v63 = vrot.slane %v231_v57, 5  ;;  %v246_v1 = vstv %s627_s15  ;;  %v250_v3 = vstv %s629_s16 }
  0x32   :  { %v227_v4 = vadd.f32 %v223_v56, %v215_v58  ;;  %v236_v5 = vrot.slane %v232_v60, 5  ;;  %v247_v6 = vmul.f32 %v246_v1, %v541_v0  ;;  %v248_v7 = vmul.f32 %v246_v1, %v548_v2 }
  0x33   :  { %v458_v8 = vpop.eup %457  ;;  %v228_v9 = vadd.f32 %v224_v62, %v216_v59  ;;  %v251_v10 = vmul.f32 %v250_v3, %v541_v0  ;;  %v252_v11 = vmul.f32 %v250_v3, %v548_v2  ;;  %v262_v13 = vstv %s634_s17 }
  0x34   :  { %v460_v15 = vpop.eup %459  ;;  %v331_v16 = vmul.f32 2.0, %v458_v8  ;;  %v239_v17 = vadd.f32 %v235_v63, %v227_v4  ;;  %v263_v18 = vmul.f32 %v262_v13, %v541_v0  ;;  %v264_v19 = vmul.f32 %v262_v13, %v548_v2 }
  0x35   :  { %v332_v20 = vmul.f32 2.0, %v460_v15  ;;  %v240_v21 = vadd.f32 %v236_v5, %v228_v9  ;;  %v255_v22 = vrot.slane %v251_v10, 1  ;;  %v256_v23 = vrot.slane %v252_v11, 1 }
  0x36   :  { %v243_v24 = vadd.f32 %v242_v61, %v239_v17  ;;  %v267_v25 = vrot.slane %v263_v18, 2  ;;  %v268_v12 = vrot.slane %v264_v19, 2  ;;  %v274_v26 = vstv %s638_s18 }
  0x37   :  { %v335_v27 = vrot.slane %v332_v20, 7  ;;  %v244_v28 = vadd.f32 %v242_v61, %v240_v21  ;;  %v259_v29 = vadd.f32 %v255_v22, %v247_v6  ;;  %v260_v30 = vadd.f32 %v256_v23, %v248_v7 }
  0x38   :  { %v341_v31 = vsub.f32 0.0, %v243_v24  ;;  %v275_v32 = vmul.f32 %v274_v26, %v541_v0  ;;  %v276_v33 = vmul.f32 %v274_v26, %v548_v2  ;;  %v286_v34 = vstv %s650_s21 }
  0x39   :  { %v336_v35 = vsel %vm320_vm0, %v331_v16, %v335_v27  ;;  %v342_v36 = vsub.f32 0.0, %v244_v28  ;;  %v271_v37 = vadd.f32 %v267_v25, %v259_v29  ;;  %v272_v38 = vadd.f32 %v268_v12, %v260_v30 }
  0x3a   :  { %447 = vst.msk [vmem:[%s701_s3 + $0x1] ss:$8 sm:$0x3] %vm611_vm1, %v336_v35  ;;  %v343_v39 = vmul.f32 1.442695, %v341_v31  ;;  %v279_v40 = vrot.slane %v275_v32, 3  ;;  %v287_v41 = vmul.f32 %v286_v34, %v541_v0  ;;  %v288_v42 = vmul.f32 %v286_v34, %v548_v2 }
  0x3b   :  { %v345_v43 = vmul.f32 1.442695, %v342_v36  ;;  %v280_v44 = vrot.slane %v276_v33, 3  ;;  %v298_v45 = vstv %s659_s22  ;;  %v310_v58 = vstv %s446_s0 }
  0x3c   :  { %461 = vpow2.f32 %v343_v39  ;;  %v283_v46 = vadd.f32 %v279_v40, %v271_v37  ;;  %v291_v47 = vrot.slane %v287_v41, 4  ;;  %v292_v48 = vrot.slane %v288_v42, 4 }
  0x3d   :  { %463 = vpow2.f32 %v345_v43  ;;  %v284_v49 = vadd.f32 %v280_v44, %v272_v38  ;;  %v299_v50 = vmul.f32 %v298_v45, %v541_v0  ;;  %v300_v51 = vmul.f32 %v298_v45, %v548_v2 }
  0x3e   :  { %v295_v52 = vadd.f32 %v291_v47, %v283_v46  ;;  %v507_v2 = vmov 0.0  }
  0x3f   :  { %v296_v53 = vadd.f32 %v292_v48, %v284_v49  ;;  %v303_v54 = vrot.slane %v299_v50, 5  ;;  %v304_v55 = vrot.slane %v300_v51, 5  ;;  %413 = vst [vmem:[%s701_s3] sm:$0xf0] %v507_v2 }
  0x40   :  { %414 = vst [vmem:[%s701_s3 + $0x8] sm:$0xf0] %v507_v2 }
  0x41   :  { %v307_v56 = vadd.f32 %v303_v54, %v295_v52  ;;  %v308_v57 = vadd.f32 %v304_v55, %v296_v53 }
  0x42   :  { %v462_v59 = vpop.eup %461 }
  0x43   :  { %v464_v60 = vpop.eup %463  ;;  %v347_v61 = vadd.f32 1.0, %v462_v59  ;;  %v311_v63 = vadd.f32 %v310_v58, %v307_v56  ;;  %v312_v1 = vadd.f32 %v310_v58, %v308_v57 }
  0x44   :  { %v348_v62 = vadd.f32 1.0, %v464_v60 }
  0x45   :  { %465 = vrcp.f32 %v347_v61  ;;  %v389_v3 = vand.u32 2147483647, %v311_v63  ;;  %v390_v4 = vand.u32 2147483647, %v312_v1  ;;  %vm354_vm2 = vweird.f32 %v347_v61 }
  0x46   :  { %467 = vrcp.f32 %v348_v62  ;;  %v358_v11 = vand.u32 2147483647, %v347_v61  ;;  %v360_v13 = vand.u32 2147483648, %v347_v61  ;;  %vm369_vm3 = vweird.f32 %v348_v62 }
  0x47   :  { %v391_v0 = vsub.f32 0.0, %v389_v3  ;;  %v392_v5 = vsub.f32 0.0, %v390_v4  ;;  %v375_v17 = vand.u32 2147483648, %v348_v62  ;;  %v373_v19 = vand.u32 2147483647, %v348_v62 }
  0x48   :  { %v361_v21 = vor.u32 1.1754944e-38, %v360_v13  ;;  %vm359_vm7 = vcmp.eq.f32.partialorder %v358_v11, 8.507059e+37  ;;  %v387_v38 = vmax.f32 %v311_v63, 0.0  ;;  %v388_v39 = vmax.f32 %v312_v1, 0.0 }
  0x49   :  { %v393_v9 = vmul.f32 1.442695, %v391_v0  ;;  %v395_v10 = vmul.f32 1.442695, %v392_v5  ;;  %v376_v24 = vor.u32 1.1754944e-38, %v375_v17  ;;  %vm374_vm9 = vcmp.eq.f32.partialorder %v373_v19, 8.507059e+37 }
  0x4b   :  { %v466_v6 = vpop.eup %465  ;;  %469 = vpow2.f32 %v393_v9 }
  0x4c   :  { %v468_v7 = vpop.eup %467  ;;  %v350_v8 = vmul.f32 %v466_v6, %v347_v61  ;;  %vm355_vm4 = vweird.f32 %v466_v6  ;;  %471 = vpow2.f32 %v395_v10 }
  0x4d   :  { %v365_v15 = vmul.f32 %v468_v7, %v348_v62  ;;  %vm370_vm5 = vweird.f32 %v468_v7  ;;  %vm356_vm6 = vmor %vm354_vm2, %vm355_vm4 }
  0x4e   :  { %v351_v16 = vsub.f32 1.0, %v350_v8  ;;  %vm371_vm8 = vmor %vm369_vm3, %vm370_vm5 }
  0x4f   :  { %v366_v18 = vsub.f32 1.0, %v365_v15 }
  0x50   :  { %v352_v20 = vmul.f32 %v466_v6, %v351_v16 }
  0x51   :  { %v367_v22 = vmul.f32 %v468_v7, %v366_v18  ;;  %v470_v12 = vpop.eup %469 }
  0x52   :  { %v353_v23 = vadd.f32 %v466_v6, %v352_v20  ;;  %v472_v27 = vpop.eup %471  ;;  %v397_v30 = vadd.f32 1.0, %v470_v12 }
  0x53   :  { %v368_v25 = vadd.f32 %v468_v7, %v367_v22  ;;  %v398_v32 = vadd.f32 1.0, %v472_v27 }
  0x54   :  { %v357_v26 = vsel %vm356_vm6, %v466_v6, %v353_v23  ;;  %473 = vlog2.f32 %v397_v30 }
  0x55   :  { %v362_v28 = vsel %vm359_vm7, %v361_v21, %v357_v26  ;;  %v372_v29 = vsel %vm371_vm8, %v468_v7, %v368_v25  ;;  %475 = vlog2.f32 %v398_v32 }
  0x56   :  { %v377_v31 = vsel %vm374_vm9, %v376_v24, %v372_v29  ;;  %v363_v33 = vmul.f32 0.04, %v362_v28 }
  0x57   :  { %v378_v34 = vmul.f32 0.04, %v377_v31 }
  0x59   :  { %v381_v35 = vrot.slane %v378_v34, 7 }
  0x5a   :  { %v474_v37 = vpop.eup %473 }
  0x5b   :  { %v382_v36 = vsel %vm320_vm0, %v363_v33, %v381_v35  ;;  %v476_v40 = vpop.eup %475  ;;  %v400_v41 = vmul.f32 0.6931472, %v474_v37 }
  0x5c   :  { %448 = vst.msk [vmem:[%s701_s3 + $0x2] ss:$8 sm:$0x3] %vm611_vm1, %v382_v36  ;;  %v402_v42 = vmul.f32 0.6931472, %v476_v40 }
  0x5d   :  { %v403_v43 = vadd.f32 %v400_v41, %v387_v38 }
  0x5e   :  { %v404_v44 = vadd.f32 %v402_v42, %v388_v39 }
  0x60   :  { %v407_v45 = vrot.slane %v404_v44, 7 }
  0x62   :  { %v408_v46 = vsel %vm320_vm0, %v403_v43, %v407_v45 }
  0x63   :  { %449 = vst.msk [vmem:[%s701_s3 + $0x3] ss:$8 sm:$0x3] %vm611_vm1, %v408_v46 }
  0x64   :  { %419 = vsyncpa [#allocation3], 1 }
  0x65   :  { %420 = vsyncpa [#allocation5], 1 }

// kernel: _track_step.3
= control target key start
LH: loop header
LB: loop body
LE: loop exit
PB: predicated region body
PF: predicated region fallthrough
CT: control target
= control target key end

     0   :  { %v81_v3 = vlaneseq  ;;  %s379_s0 = inlined_call_operand.<no memory space> [shape: f32[1], index: 0, kind: input, shape index: {}]   ;;  %s380_s1 = inlined_call_operand.vmem [shape: f32[2,256], index: 1, kind: input, shape index: {}]   ;;  %s381_s2 = inlined_call_operand.vmem [shape: f32[1,8,256], index: 2, kind: input, shape index: {}]   ;;  %s382_s3 = inlined_call_operand.vmem [shape: f32[1,8,256], index: 3, kind: input, shape index: {}]   ;;  %s383_s4 = inlined_call_operand.hbm [shape: f32[8,256], index: 4, kind: output, shape index: {}]  }
   0x1   :  { %v20_v0 = vld [vmem:[%s381_s2] sm:$0xff]  ;;  %v21_v2 = vld [vmem:[%s381_s2 + $0x8] sm:$0xff] }
   0x2   :  { %v22_v1 = vld [vmem:[%s382_s3] sm:$0xff]  ;;  %v28_v5 = vmul.f32 %v20_v0, %v20_v0  ;;  %v23_v7 = vld [vmem:[%s382_s3 + $0x8] sm:$0xff]  ;;  %v29_v8 = vmul.f32 %v21_v2, %v21_v2 }
   0x3   :  { %v24_v4 = vadd.f32 %v22_v1, %v20_v0  ;;  %v30_v6 = vmul.f32 %v22_v1, %v22_v1 }
   0x4   :  { %10 = vsyncpa [#allocation5], 0  ;;  %v25_v9 = vadd.f32 %v23_v7, %v21_v2  ;;  %v31_v10 = vmul.f32 %v23_v7, %v23_v7  ;;  %vm78_vm0 = vcmask 1040384   ;;  %vm353_vm1 = vcmp.lt.s32.totalorder %v81_v3, 256  ;;  %s315_s26 = smov [#allocation4]   ;;  %s272_s30 = sshll.u32 %s383_s4, 4  ;;  %s273_s30 = int_to_ptr.hbm [resolvable:$true] %s272_s30 }
   0x5   :  { %v32_v11 = vadd.f32 %v30_v6, %v28_v5  ;;  %87 = vst [vmem:[#allocation1] sm:$0xff] %v24_v4  ;;  %v26_v16 = vmax.f32 %v20_v0, %v22_v1  ;;  %v314_v17 = vmov 0.0   ;;  %v27_v18 = vmax.f32 %v21_v2, %v23_v7  ;;  %v241_v23 = vld [vmem:[%s380_s1] ss:$2 sm:$0x3]  ;;  %s270_s27 = sshll.u32 %s315_s26, 4  ;;  %s271_s27 = int_to_ptr.vmem [resolvable:$true] %s270_s27 }
   0x6   :  { %v33_v12 = vadd.f32 %v31_v10, %v29_v8  ;;  %v77_v13 = vrot.slane %v25_v9, 7  ;;  %88 = vst [vmem:[#allocation1 + $0x9] sm:$0xff] %v25_v9  ;;  %v281_v33 = vld [vmem:[%s380_s1 + $0x1] ss:$2 sm:$0x3]  ;;  %v58_v48 = vstv %s379_s0 }
   0x7   :  { %284 = vrsqrt.f32 %v32_v11  ;;  %115 = vst [vmem:[#allocation4] sm:$0xf0] %v314_v17  ;;  %vm41_vm4 = vcmp.eq.f32.partialorder %v32_v11, inf  ;;  %vm43_vm5 = vcmp.eq.f32.partialorder %v32_v11, 0.0  ;;  %v44_v36 = vand.u32 2147483648, %v32_v11 }
   0x8   :  { %v79_v15 = vsel %vm78_vm0, %v24_v4, %v77_v13  ;;  %286 = vrsqrt.f32 %v33_v12  ;;  %116 = vst [vmem:[#allocation4 + $0x8] sm:$0xf0] %v314_v17  ;;  %vm53_vm6 = vcmp.eq.f32.partialorder %v33_v12, inf  ;;  %v56_v40 = vand.u32 2147483648, %v33_v12 }
   0x9   :  { %85 = vst.msk [vmem:[#allocation4] ss:$8 sm:$0x3] %vm353_vm1, %v79_v15  ;;  %vm55_vm8 = vcmp.eq.f32.partialorder %v33_v12, 0.0  ;;  %vm59_vm13 = vcmp.gt.f32.partialorder %v26_v16, %v58_v48  ;;  %vm60_vm14 = vcmp.gt.f32.partialorder %v27_v18, %v58_v48 }
   0xd   :  { %v285_v19 = vpop.eup %284  ;;  %v90_v20 = vld [vmem:[#allocation1 + $0x1] ss:$9 sm:$0xff] }
   0xe   :  { %v287_v21 = vpop.eup %286  ;;  %97 = vst [vmem:[#allocation1] sm:$0xff] %v26_v16  ;;  %v35_v22 = vmul.f32 %v285_v19, %v32_v11 }
   0xf   :  { %98 = vst [vmem:[#allocation1 + $0x9] sm:$0xff] %v27_v18  ;;  %v47_v24 = vmul.f32 %v287_v21, %v33_v12 }
  0x10   :  { %93 = vst.msk [vmem:[#allocation4 + $0x1] ss:$8 sm:$0x3] %vm353_vm1, %v90_v20  ;;  %v36_v25 = vmul.f32 %v285_v19, %v35_v22  ;;  %v242_v26 = vld [vmem:[#allocation4] ss:$8 sm:$0x3] }
  0x11   :  { %v48_v27 = vmul.f32 %v287_v21, %v47_v24  ;;  %v243_v28 = vadd.f32 %v242_v26, %v241_v23 }
  0x12   :  { %v37_v29 = vmul.f32 0.5, %v36_v25 }
  0x13   :  { %v49_v30 = vmul.f32 0.5, %v48_v27  ;;  %vm249_vm2 = vcmp.lt.f32.partialorder %v243_v28, 0.0  ;;  %vm250_vm3 = vcmp.gt.f32.partialorder %v243_v28, 15.0 }
  0x14   :  { %v38_v31 = vsub.f32 1.5, %v37_v29  ;;  %vm251_vm7 = vmor %vm249_vm2, %vm250_vm3 }
  0x15   :  { %v50_v32 = vsub.f32 1.5, %v49_v30 }
  0x16   :  { %v100_v34 = vld [vmem:[#allocation1 + $0x2] ss:$9 sm:$0xff]  ;;  %v39_v35 = vmul.f32 %v285_v19, %v38_v31 }
  0x17   :  { %103 = vst.msk [vmem:[#allocation4 + $0x2] ss:$8 sm:$0x3] %vm353_vm1, %v100_v34  ;;  %v51_v37 = vmul.f32 %v287_v21, %v50_v32  ;;  %v247_v38 = vld [vmem:[#allocation4 + $0x1] ss:$8 sm:$0x3] }
  0x18   :  { %v40_v39 = vmul.f32 %v39_v35, %v32_v11  ;;  %v248_v41 = vadd.f32 %v281_v33, %v247_v38 }
  0x19   :  { %v52_v42 = vmul.f32 %v51_v37, %v33_v12 }
  0x1a   :  { %v42_v43 = vsel %vm41_vm4, %v32_v11, %v40_v39  ;;  %vm252_vm9 = vcmp.lt.f32.partialorder %v248_v41, 0.0  ;;  %vm254_vm10 = vcmp.gt.f32.partialorder %v248_v41, 15.0 }
  0x1b   :  { %v45_v44 = vsel %vm43_vm5, %v44_v36, %v42_v43  ;;  %v54_v45 = vsel %vm53_vm6, %v33_v12, %v52_v42  ;;  %vm253_vm11 = vmor %vm251_vm7, %vm252_vm9 }
  0x1c   :  { %v61_v46 = vsub.f32 0.0, %v45_v44  ;;  %107 = vst [vmem:[#allocation1] sm:$0xff] %v45_v44  ;;  %v57_v47 = vsel %vm55_vm8, %v56_v40, %v54_v45  ;;  %vm255_vm12 = vmor %vm253_vm11, %vm254_vm10 }
  0x1d   :  { %v62_v49 = vsub.f32 0.0, %v57_v47  ;;  %108 = vst [vmem:[#allocation1 + $0x9] sm:$0xff] %v57_v47 }
  0x1e   :  { %v257_v50 = vld [vmem:[#allocation4 + $0x2] ss:$8 sm:$0x3]  ;;  %v65_v51 = vrot.slane %v61_v46, 1 }
  0x1f   :  { %v258_v52 = vsel %vm255_vm12, 1.0, %v257_v50  ;;  %v66_v53 = vrot.slane %v62_v49, 1 }
  0x20   :  { %263 = vst.msk [vmem:[#allocation4 + $0x2] ss:$8 sm:$0x3] %vm353_vm1, %v258_v52  ;;  %v69_v54 = vsel %vm59_vm13, -inf, %v65_v51 }
  0x21   :  { %v70_v56 = vsel %vm60_vm14, -inf, %v66_v53 }
  0x24   :  { %v110_v55 = vld [vmem:[#allocation1 + $0x3] ss:$9 sm:$0xff] }
  0x25   :  { %113 = vst.msk [vmem:[#allocation4 + $0x3] ss:$8 sm:$0x3] %vm353_vm1, %v110_v55 }
  0x26   :  { %119 = vst [vmem:[#allocation1] sm:$0xff] %v69_v54  ;;  %275 = dma.vmem_to_hbm [thread:$0]  %s271_s27, 256, %s273_s30, [#allocation5]  }
  0x27   :  { %120 = vst [vmem:[#allocation1 + $0x9] sm:$0xff] %v70_v56 }
  0x28   :  { %312 = dma.done.wait [#allocation5], 256  }
  0x29   :  { %313 = vsyncadd [#allocation5], 4294967040 }
  0x2a   :  { %280 = vsyncpa [#allocation5], 1 }

</bundles_post_ra>
